<compile_context>
chip_gen: v6e
topology: v6e:2x2x1
jax: 0.10.0
libtpu: 0.0.40
codegen_flags: <defaults>
</compile_context>

<pallas_src>
import math

import jax
import jax.numpy as jnp
from jax.experimental import pallas as pl
from jax.experimental.pallas import tpu as pltpu

_LANE = 128


def make_positional_encoding(d_model: int, max_len: int = 5000, dtype=jnp.float32):
    """Builds the (1, max_len, d_model) sinusoidal PE table, matching PyTorch init."""
    if d_model % 2 != 0:
        # The PyTorch original also breaks for odd d_model; fail loudly.
        raise ValueError("d_model must be even")
    position = jnp.arange(0, max_len, dtype=jnp.float32)[:, None]            # (max_len, 1)
    div_term = jnp.exp(
        jnp.arange(0, d_model, 2, dtype=jnp.float32) * (-math.log(10000.0) / d_model)
    )                                                                        # (d_model//2,)
    angles = position * div_term                                             # (max_len, d_model//2)
    pe = jnp.zeros((max_len, d_model), dtype=jnp.float32)
    pe = pe.at[:, 0::2].set(jnp.sin(angles))
    pe = pe.at[:, 1::2].set(jnp.cos(angles))
    return pe[None, :, :].astype(dtype)                                      # (1, max_len, d_model)


def _add_pe_kernel(x_ref, pe_ref, o_ref):
    # x_ref / o_ref: (bB, tR, C); pe_ref: (tR, C), shared by every batch row.
    o_ref[...] = x_ref[...] + pe_ref[...][None]


def _sublane_align(dtype) -> int:
    # 8 rows for 4-byte dtypes, 16 for bf16/fp16, 32 for int8/fp8 (vreg packing).
    return max(8, 32 // jnp.dtype(dtype).itemsize)


def _target_block_bytes() -> int:
    """Per-generation block budget.

    x / out / pe are each double-buffered, so ~6 blocks are resident.  Keep
    that inside the scoped-VMEM defaults (16 MiB on v5e and older, 32 MiB on
    v6e/v7x) so no vmem_limit_bytes override is needed.
    """
    try:
        kind = jax.devices()[0].device_kind.lower()
    except Exception:
        kind = ""
    if ("v6" in kind) or ("v7" in kind) or ("tpu7" in kind):
        return 4 * 1024 * 1024    # v6e / v7x: ~24 MiB resident at 4 MiB blocks
    return 2 * 1024 * 1024        # v5e & older: ~12 MiB resident


def _pick_lane_layout(S: int, D: int):
    """View one (S, D) slab as (R, C) with C a multiple of 128 when possible."""
    if D % _LANE == 0:
        return S, D                          # already lane-dense
    flat = S * D
    if flat % _LANE == 0:
        for c in (1024, 896, 768, 640, 512, 384, 256, 128):
            if flat % c == 0:
                return flat // c, c          # lane-dense flattened view
    # Fallback: natural layout.  Stores on the narrow last dim are lane-masked
    # (vst.msk, ~4x slower); pad d_model to a multiple of 128 at the model
    # level if this path is ever hot.  Still correct.
    return S, D


def _pick_row_tile(R: int, C: int, itemsize: int, sublane: int, target_bytes: int) -> int:
    """Largest sublane-aligned row tile whose block stays under target_bytes.

    tR does NOT need to divide R: the grid uses pl.cdiv and Pallas masks the
    partial last tile, so awkward R never forces a pathological full-R block.
    """
    max_rows = target_bytes // (C * itemsize)
    if R <= max_rows:
        return R
    return max(sublane, (max_rows // sublane) * sublane)


def positional_encoding_forward(
    x: jax.Array,
    pe: jax.Array,
    *,
    donate_x: bool = False,
    target_block_bytes: int | None = None,
) -> jax.Array:
    """y = x + pe[:, :x.shape[1], :], computed with a Pallas TPU kernel.

    x:  (B, S, D)
    pe: (1, max_len, D) with max_len >= S (ideally already in x.dtype)
    donate_x: alias x's buffer to the output (only when x is dead afterwards).
    target_block_bytes: override the per-block VMEM budget (testing/tuning).
    """
    B, S, D = x.shape
    assert pe.ndim == 3 and pe.shape[0] == 1 and pe.shape[2] == D
    max_len = pe.shape[1]
    assert S <= max_len, "sequence length exceeds max_len of the PE table"

    if pe.dtype != x.dtype:
        # Avoid this per-call cast by building the table in the activation dtype.
        pe = pe.astype(x.dtype)

    itemsize = jnp.dtype(x.dtype).itemsize
    sublane = _sublane_align(x.dtype)
    target = _target_block_bytes() if target_block_bytes is None else int(target_block_bytes)

    # Lane-dense per-batch view (pure reshape of contiguous row-major data).
    R, C = _pick_lane_layout(S, D)
    x_v = x.reshape(B, R, C)

    slab_bytes = R * C * itemsize
    if slab_bytes <= target:
        # Small per-batch slab: pack several batches per block; PE is one block
        # with a constant index_map, so it is fetched exactly once.
        tR = R
        bB = int(min(B, max(1, target // slab_bytes)))
    else:
        # Large slab: tile the row axis; one batch per block.
        tR = _pick_row_tile(R, C, itemsize, sublane, target)
        bB = 1
    n_row_tiles = pl.cdiv(R, tR)
    n_batch_tiles = pl.cdiv(B, bB)

    # PE view: reinterpret the whole table when possible (pure reshape, no
    # copy); otherwise slice the first S rows once (S*D elems, negligible).
    if (max_len * D) % C == 0:
        pe_v = pe.reshape((max_len * D) // C, C)
    else:
        pe_v = pe[0, :S, :].reshape(R, C)
    if tR % 8 != 0 and pe_v.shape[0] != tR:
        # Block-shape rule: a block that does not span the whole second-minor
        # dim must be 8-row aligned.  tR < R is aligned by construction, so
        # only tR == R with non-aligned R needs an exact-sized PE view.
        pe_v = pe_v[:R]

    cost = pl.CostEstimate(
        flops=B * S * D,
        transcendentals=0,
        bytes_accessed=(2 * B * S * D + S * D) * itemsize,
    )

    out = pl.pallas_call(
        _add_pe_kernel,
        out_shape=jax.ShapeDtypeStruct((B, R, C), x.dtype),
        grid_spec=pltpu.PrefetchScalarGridSpec(
            num_scalar_prefetch=0,
            # Batch axis innermost and the PE index_map independent of it, so
            # the PE tile's DMA is reused across consecutive batch steps.
            grid=(n_row_tiles, n_batch_tiles),
            in_specs=[
                pl.BlockSpec((bB, tR, C), lambda t, b: (b, t, 0)),   # x tile
                pl.BlockSpec((tR, C), lambda t, b: (t, 0)),          # shared PE tile
            ],
            out_specs=pl.BlockSpec((bB, tR, C), lambda t, b: (b, t, 0)),
        ),
        compiler_params=pltpu.CompilerParams(
            dimension_semantics=("parallel", "parallel"),
        ),
        cost_estimate=cost,
        input_output_aliases=({0: 0} if donate_x else {}),
    )(x_v, pe_v)

    return out.reshape(B, S, D)


if __name__ == "__main__":
    key = jax.random.PRNGKey(0)

    # (B, S, D, max_len, donate_x, target_block_bytes_override)
    configs = [
        (2, 8, 32, 64, False, None),     # D < 128 -> lane-dense flattened slab, batch-packed
        (2, 16, 128, 32, True, None),    # D % 128 == 0, batch-packed, donated input
        (3, 20, 128, 64, False, 4096),   # forced row tiling with cdiv partial last row tile
        (3, 8, 128, 16, False, 8192),    # batch packing with cdiv partial last batch tile
        (2, 7, 20, 16, False, None),     # non-lane-dense fallback path (C == D == 20)
    ]

    for i, (B, S, D, MAX_LEN, donate, tgt) in enumerate(configs):
        k = jax.random.fold_in(key, i)
        x = jax.random.normal(k, (B, S, D), dtype=jnp.float32)
        pe = make_positional_encoding(d_model=D, max_len=MAX_LEN, dtype=x.dtype)

        # Reference in plain JAX (same semantics as the PyTorch forward),
        # computed before the kernel call so donated configs stay valid.
        y_ref = jax.block_until_ready(x + pe[:, :S, :])

        y = jax.block_until_ready(
            positional_encoding_forward(x, pe, donate_x=donate, target_block_bytes=tgt)
        )

        assert y.shape == (B, S, D)
        assert jnp.allclose(y, y_ref, atol=1e-6, rtol=1e-6), f"mismatch vs reference (config {i})"

    print("KERNEL_OK")
</pallas_src>

<mosaic_0001>
module attributes {stable_mosaic.version = 11 : i64} {
  func.func @_add_pe_kernel(%arg0: i32, %arg1: i32, %arg2: memref<2x1x256xf32, #tpu.memory_space<vmem>>, %arg3: memref<1x256xf32, #tpu.memory_space<vmem>>, %arg4: memref<2x1x256xf32, #tpu.memory_space<vmem>>) attributes {dimension_semantics = [#tpu.dimension_semantics<parallel>, #tpu.dimension_semantics<parallel>], iteration_bounds = array<i64: 1, 1>, scalar_prefetch = 0 : i64, scratch_operands = 0 : i64, tpu.core_type = #tpu.core_type<tc>, window_params = [{transform_indices = @transform_0, window_bounds = array<i64: 2, 1, 256>}, {transform_indices = @transform_1, window_bounds = array<i64: 1, 256>}, {transform_indices = @transform_2, window_bounds = array<i64: 2, 1, 256>}]} {
    %c0 = arith.constant 0 : index
    %c0_0 = arith.constant 0 : index
    %c0_1 = arith.constant 0 : index
    %0 = vector.load %arg2[%c0, %c0_0, %c0_1] : memref<2x1x256xf32, #tpu.memory_space<vmem>>, vector<2x1x256xf32>
    %c0_2 = arith.constant 0 : index
    %c0_3 = arith.constant 0 : index
    %1 = vector.load %arg3[%c0_2, %c0_3] : memref<1x256xf32, #tpu.memory_space<vmem>>, vector<1x256xf32>
    %2 = vector.shape_cast %1 : vector<1x256xf32> to vector<1x1x256xf32>
    %3 = vector.broadcast %2 : vector<1x1x256xf32> to vector<2x1x256xf32>
    %4 = arith.addf %0, %3 : vector<2x1x256xf32>
    %c0_4 = arith.constant 0 : index
    %c0_5 = arith.constant 0 : index
    %c0_6 = arith.constant 0 : index
    %5 = vector.load %arg4[%c0_4, %c0_5, %c0_6] : memref<2x1x256xf32, #tpu.memory_space<vmem>>, vector<2x1x256xf32>
    tpu.vector_store %arg4[%c0_4, %c0_5, %c0_6], %4 {strides = array<i32>} : memref<2x1x256xf32, #tpu.memory_space<vmem>>, vector<2x1x256xf32>,
    return
  }
  func.func @transform_0(%arg0: i32, %arg1: i32) -> (i32, i32, i32) {
    %c0_i32 = arith.constant 0 : i32
    %c0_i32_0 = arith.constant 0 : i32
    return %arg1, %arg0, %c0_i32 : i32, i32, i32
  }
  func.func @transform_1(%arg0: i32, %arg1: i32) -> (i32, i32) {
    %c0_i32 = arith.constant 0 : i32
    %c0_i32_0 = arith.constant 0 : i32
    return %arg0, %c0_i32 : i32, i32
  }
  func.func @transform_2(%arg0: i32, %arg1: i32) -> (i32, i32, i32) {
    %c0_i32 = arith.constant 0 : i32
    %c0_i32_0 = arith.constant 0 : i32
    return %arg1, %arg0, %c0_i32 : i32, i32, i32
  }
}

</mosaic_0001>

<bundles_post_ra>
// kernel: tpu_custom_call.1
= control target key start
LH: loop header
LB: loop body
LE: loop exit
PB: predicated region body
PF: predicated region fallthrough
CT: control target
= control target key end

     0   :  { %7 = vsyncpa [#allocation3], 0  ;;  %s173_s0 = inlined_call_operand.hbm [shape: f32[2,1,256], index: 0, kind: input, shape index: {}]   ;;  %s174_s1 = inlined_call_operand.hbm [shape: f32[1,256], index: 1, kind: input, shape index: {}]   ;;  %s175_s2 = inlined_call_operand.hbm [shape: f32[2,1,256], index: 2, kind: output, shape index: {}]  }
   0x1   :  { %8 = vsyncpa [#allocation6], 0 }
   0x2   :  { %9 = vsyncpa [#allocation4], 0  ;;  %s138_s9 = smov [#allocation2]  }
   0x3   :  { %s15_s10 = sshll.u32 %s138_s9, 4  ;;  %s16_s10 = int_to_ptr.vmem [resolvable:$true] %s15_s10 }
   0x4   :  { %s80_s11 = scalar_lea.vmem %s16_s10, 64  ;;  %p85_p1 = scmp.lt.s32.totalorder %s16_s10, %s16_s10 }
   0x5   :  { %p81_p0 = scmp.ne.s32.totalorder %s16_s10, %s80_s11  ;;  %p86_p2 = scmp.lt.s32.totalorder %s80_s11, %s80_s11 }
   0x7   :  { %p87_p3 = por %p86_p2, %p85_p1 }
   0x9   :  { %p88_p4 = pnand %p87_p3, %p81_p0 }
   0xb   :  { %91 = shalt.err (!%p88_p4)
}
   0xc   :  { %s139_s12 = smov 32   ;;  %s140_s13 = smov 2  }
   0xd   :  { %21 = dma.hbm_to_vmem [thread:$0]  %s173_s0, 64, %s16_s10, [#allocation3], %s139_s12, %s139_s12, %s140_s13  }
   0xe   :  { %s141_s16 = smov [#allocation5]  }
   0xf   :  { %s28_s17 = sshll.u32 %s141_s16, 4  ;;  %s29_s17 = int_to_ptr.vmem [resolvable:$true] %s28_s17 }
  0x10   :  { %s100_s18 = scalar_lea.vmem %s29_s17, 32  ;;  %p105_p6 = scmp.lt.s32.totalorder %s29_s17, %s29_s17 }
  0x11   :  { %p101_p5 = scmp.ne.s32.totalorder %s29_s17, %s100_s18  ;;  %p106_p7 = scmp.lt.s32.totalorder %s100_s18, %s100_s18 }
  0x13   :  { %p107_p8 = por %p106_p7, %p105_p6 }
  0x15   :  { %p108_p9 = pnand %p107_p8, %p101_p5 }
  0x17   :  { %111 = shalt.err (!%p108_p9)
}
  0x18   :  { %31 = dma.hbm_to_vmem [thread:$0]  %s174_s1, 32, %s29_s17, [#allocation6]  }
  0x19   :  { %132 = dma.done.wait [#allocation3], 64  }
  0x1a   :  { %133 = vsyncadd [#allocation3], 4294967232 }
  0x1b   :  { %134 = dma.done.wait [#allocation6], 32  }
  0x1c   :  { %135 = vsyncadd [#allocation6], 4294967264  ;;  %v43_v0 = vlaneseq  ;;  %s142_s0 = smov [#allocation7]   ;;  %v38_v1 = vld [vmem:[#allocation2] sm:$0x3] }
  0x1d   :  { %s54_s21 = sshll.u32 %s142_s0, 4  ;;  %v40_v2 = vld [vmem:[#allocation5] sm:$0x3]  ;;  %v39_v3 = vld [vmem:[#allocation2 + $0x2] sm:$0x3]  ;;  %s55_s21 = int_to_ptr.vmem [resolvable:$true] %s54_s21 }
  0x1e   :  { %vm45_vm0 = vcmp.lt.s32.totalorder %v43_v0, 256  ;;  %v41_v4 = vadd.f32 %v40_v2, %v38_v1  ;;  %v42_v5 = vadd.f32 %v40_v2, %v39_v3  ;;  %s112_s22 = scalar_lea.vmem %s55_s21, 64  ;;  %p117_p11 = scmp.lt.s32.totalorder %s55_s21, %s55_s21 }
  0x1f   :  { %p113_p10 = scmp.ne.s32.totalorder %s55_s21, %s112_s22  ;;  %p118_p12 = scmp.lt.s32.totalorder %s112_s22, %s112_s22 }
  0x20   :  { %47 = vst.msk [vmem:[#allocation7] sm:$0x3] %vm45_vm0, %v41_v4  ;;  %48 = vst.msk [vmem:[#allocation7 + $0x2] sm:$0x3] %vm45_vm0, %v42_v5 }
  0x21   :  { %p119_p13 = por %p118_p12, %p117_p11 }
  0x23   :  { %p120_p0 = pnand %p119_p13, %p113_p10 }
  0x25   :  { %123 = shalt.err (!%p120_p0)
}
  0x26   :  { %60 = dma.vmem_to_hbm [thread:$0]  %s55_s21, 64, %s175_s2, [#allocation4], %s139_s12, %s139_s12, %s140_s13  }
  0x27   :  { %136 = dma.done.wait [#allocation4], 64  }
  0x28   :  { %137 = vsyncadd [#allocation4], 4294967232 }
  0x29   :  { %64 = vsyncpa [#allocation3], 1 }
  0x2a   :  { %65 = vsyncpa [#allocation6], 1 }
  0x2b   :  { %66 = vsyncpa [#allocation4], 1 }

</bundles_post_ra>
